<compile_context>
chip_gen: v5e
topology: v5e:2x2
jax: 0.10.0
libtpu: 0.0.40
codegen_flags: <defaults>
</compile_context>

<pallas_src>
import functools
import math

import jax
import jax.numpy as jnp
from jax.experimental import pallas as pl
from jax.experimental.pallas import tpu as pltpu


# ----------------------------------------------------------------------------
# pe buffer construction — matches PyTorch __init__ (register_buffer 'pe').
# ----------------------------------------------------------------------------
def make_positional_encoding_table(embedding_dim_size=32, max_sentences=9999):
    assert embedding_dim_size % 2 == 0, "embedding_dim_size must be even"
    position = jnp.arange(0, max_sentences, dtype=jnp.float32)[:, None]            # (L, 1)
    div_term = jnp.exp(
        jnp.arange(0, embedding_dim_size, 2, dtype=jnp.float32)
        * (-math.log(10000.0) / embedding_dim_size))                               # (D/2,)
    angles = position * div_term                                                    # (L, D/2)
    pe = jnp.zeros((max_sentences, embedding_dim_size), dtype=jnp.float32)
    pe = pe.at[:, 0::2].set(jnp.sin(angles))
    pe = pe.at[:, 1::2].set(jnp.cos(angles))
    return pe                                                                       # (L, D)


# ----------------------------------------------------------------------------
# Kernel: elementwise add, accumulated in f32 (matches torch promotion).
# pe_ref broadcasts over rows when its row extent is 1 (legacy path).
# ----------------------------------------------------------------------------
def _pos_enc_add_kernel(x_ref, pe_ref, o_ref):
    o_ref[...] = (x_ref[...].astype(jnp.float32)
                  + pe_ref[...].astype(jnp.float32)).astype(o_ref.dtype)


# ----------------------------------------------------------------------------
# Tiling helpers.
# ----------------------------------------------------------------------------
def _round_down(x, m):
    return (x // m) * m


def _largest_divisor_multiple(n, unit, cap):
    """Largest d with d % unit == 0, d | n, d <= cap. Returns 0 if none."""
    if n % unit != 0:
        return 0
    cap = min(cap, n)
    if cap < unit:
        return 0
    m = n // unit
    for k in range(cap // unit, 0, -1):
        if m % k == 0:
            return k * unit
    return 0


def _best_batch_factor(b, p, pack, row_target):
    """Largest k | b with (k*p) % pack == 0 and k*p <= row_target. 0 if none."""
    kmax = min(b, row_target // p) if p > 0 else 0
    for k in range(kmax, 0, -1):
        if b % k == 0 and (k * p) % pack == 0:
            return k
    return 0


def _default_block_bytes_target():
    # v7x: 3.2 TB/s HBM makes the ~0.35us per-step cost visible at 4 MiB blocks,
    # so use bigger steps there; keep total scoped VMEM well under its 64 MiB.
    try:
        info = pltpu.get_tpu_info()
        if "7" in str(getattr(info, "chip_version", "")):
            return 6 * 1024 * 1024
    except Exception:
        pass
    return 4 * 1024 * 1024


def _vmem_limit(step_bytes):
    # double-buffered blocks + margin for compiler-internal scratch; never the full
    # 64 MiB of v7x physical VMEM.
    need = 2 * step_bytes + (2 << 20)
    return int(min(max(need, 16 << 20), 48 << 20))


# ----------------------------------------------------------------------------
# Forward.
# ----------------------------------------------------------------------------
def positional_encoding_forward(
    embedding,
    pe_table,
    *,
    lane_tile_target=8192,       # multiple of 128; lane width of the refolded 2D layout
    block_bytes_target=None,     # per-block byte budget (auto: 4 MiB, 6 MiB on v7x)
    force_pallas=False,
    donate_embedding=False,      # adds input_output_aliases={0: 0} when dtypes allow
):
    """embedding: (B, S, D); pe_table: (max_sentences, D). Returns (B, S, D)."""
    assert embedding.ndim == 3, "embedding must be (batch, seq, dim)"
    B, S, D = embedding.shape
    L, Dp = pe_table.shape
    assert D == Dp, f"embedding dim {D} != pe table dim {Dp}"
    assert S <= L, f"seq_len {S} exceeds max_sentences {L}"

    out_dtype = jnp.promote_types(embedding.dtype, pe_table.dtype)
    pe_slice = pe_table[:S]                       # static slice; keep pe in its (f32) dtype
    total = S * D
    lane_dense = (total % 128) == 0

    x_itemsize = jnp.dtype(embedding.dtype).itemsize
    out_itemsize = jnp.dtype(out_dtype).itemsize
    pe_itemsize = jnp.dtype(pe_slice.dtype).itemsize
    max_item = max(x_itemsize, out_itemsize, pe_itemsize)
    # packed sublane tile: (8,128) f32, (16,128) bf16/f16, (32,128) int8/fp8
    pack = max(8, 32 // x_itemsize, 32 // out_itemsize)

    too_small = embedding.size * x_itemsize < (1 << 18)   # < 256 KiB
    if (too_small or not lane_dense) and not force_pallas:
        # Fixed pallas_call/DMA setup cost dominates tiny/ragged shapes; XLA's fused
        # broadcast-add is already at the HBM roofline for a standalone op.
        return embedding + pe_slice[None]

    if block_bytes_target is None:
        block_bytes_target = _default_block_bytes_target()

    # --- Plan the sublane-dense refold: x -> (R, C) with R = B*P, C | S*D, pe -> (P, C) ----
    plan = None
    if lane_dense:
        C = _largest_divisor_multiple(total, 128, lane_tile_target)   # >= 128 here
        P = total // C                                                # pe period in rows
        R = B * P                                                     # total rows
        row_target = max(pack, _round_down(block_bytes_target // (C * max_item), pack))
        row_target = min(row_target, 1024)
        # Keep >= 2 grid steps whenever possible so megacore (v7x) can split the work.
        if R >= 2 * pack:
            row_target = min(row_target, max(pack, _round_down(R // 2, pack)))

        k = _best_batch_factor(B, P, pack, row_target)      # T = k*P  -> pe resident once
        T_resident = k * P
        T_phased = _largest_divisor_multiple(P, pack, row_target)   # T | P -> phase grid
        if T_resident >= T_phased and T_resident > 0:
            plan = ("pe_resident", T_resident, C, P, R)
        elif T_phased > 0:
            plan = ("pe_phased", T_phased, C, P, R)

    if plan is None and not force_pallas:
        # Awkward batch/period factorization: XLA handles it at roofline anyway.
        return embedding + pe_slice[None]

    aliases = {0: 0} if (donate_embedding and embedding.dtype == out_dtype) else {}

    if plan is not None:
        kind, T, C, P, R = plan
        x2d = embedding.reshape(R, C)
        pe2d = pe_slice.reshape(P, C)

        if kind == "pe_resident":
            # Each (T, C) row block covers T // P whole pe periods; materialize that
            # (<= block_bytes_target) once so the pe block index is constant -> one DMA total.
            pe_arg = pe2d if T == P else jnp.tile(pe2d, (T // P, 1))
            grid = (R // T,)
            in_specs = [
                pl.BlockSpec((T, C), lambda i: (i, 0)),
                pl.BlockSpec((T, C), lambda i: (0, 0)),       # constant -> fetched once
            ]
            out_specs = pl.BlockSpec((T, C), lambda i: (i, 0))
            semantics = ("parallel",)
        else:  # "pe_phased": pe period larger than the row tile
            pe_arg = pe2d
            nphase = P // T
            grid = (nphase, B)                                # batch is the inner (fast) axis
            in_specs = [
                pl.BlockSpec((T, C), lambda i, j: (j * nphase + i, 0)),
                pl.BlockSpec((T, C), lambda i, j: (i, 0)),    # constant across inner sweep
            ]
            out_specs = pl.BlockSpec((T, C), lambda i, j: (j * nphase + i, 0))
            semantics = ("parallel", "parallel")

        step_bytes = T * C * (x_itemsize + out_itemsize + pe_itemsize)
        out2d = pl.pallas_call(
            _pos_enc_add_kernel,
            out_shape=jax.ShapeDtypeStruct((R, C), out_dtype),
            grid_spec=pltpu.PrefetchScalarGridSpec(
                num_scalar_prefetch=0,
                grid=grid,
                in_specs=in_specs,
                out_specs=out_specs,
            ),
            compiler_params=pltpu.CompilerParams(
                dimension_semantics=semantics,
                vmem_limit_bytes=_vmem_limit(step_bytes),
            ),
            input_output_aliases=aliases,
        )(x2d, pe_arg)
        return out2d.reshape(B, S, D)

    # --- Legacy fallback (force_pallas with tiny / non-lane-dense / awkward shapes) --------
    # (B, S*D) layout, full batch extent per block, 1-D grid over lane tiles.
    x2d = embedding.reshape(B, total)
    pe_arg = pe_slice.reshape(1, total)
    if lane_dense:
        lane_cap = min(lane_tile_target,
                       max(128, _round_down(block_bytes_target // max(B * max_item, 1), 128)))
        tile_lanes = _largest_divisor_multiple(total, 128, lane_cap) or 128
    else:
        tile_lanes = total                       # full extent: always a legal block dim
    grid = (total // tile_lanes,)
    step_bytes = B * tile_lanes * (x_itemsize + out_itemsize) + tile_lanes * pe_itemsize
    out2d = pl.pallas_call(
        _pos_enc_add_kernel,
        out_shape=jax.ShapeDtypeStruct((B, total), out_dtype),
        grid_spec=pltpu.PrefetchScalarGridSpec(
            num_scalar_prefetch=0,
            grid=grid,
            in_specs=[
                pl.BlockSpec((B, tile_lanes), lambda j: (0, j)),
                pl.BlockSpec((1, tile_lanes), lambda j: (0, j)),
            ],
            out_specs=pl.BlockSpec((B, tile_lanes), lambda j: (0, j)),
        ),
        compiler_params=pltpu.CompilerParams(
            dimension_semantics=("parallel",),
            vmem_limit_bytes=_vmem_limit(step_bytes),
        ),
        input_output_aliases=aliases,
    )(x2d, pe_arg)
    return out2d.reshape(B, S, D)


if __name__ == "__main__":
    pe_table = make_positional_encoding_table(embedding_dim_size=32, max_sentences=9999)
    key = jax.random.PRNGKey(0)
    k0, k1, k2, k3 = jax.random.split(key, 4)

    # Keep the wrapper under jit so the pe slice/reshape is cached per shape (review item).
    fwd = jax.jit(functools.partial(positional_encoding_forward, force_pallas=True))

    # 1) Small demo shape from the module defaults (batch=2, seq=8, hidden=32).
    B, S, D = 2, 8, 32
    emb = jax.random.normal(k0, (B, S, D), dtype=jnp.float32)
    out = jax.block_until_ready(fwd(emb, pe_table))
    ref = emb + pe_table[None, :S, :]
    assert out.shape == (B, S, D) and out.dtype == ref.dtype
    assert jnp.allclose(out, ref, atol=1e-6, rtol=1e-6), "mismatch (small demo)"

    # 2) "pe resident" refold path: multi-step parallel grid, pe DMA'd once.
    B, S, D = 16, 512, 32
    emb = jax.random.normal(k1, (B, S, D), dtype=jnp.float32)
    out = jax.block_until_ready(fwd(emb, pe_table))
    ref = emb + pe_table[None, :S, :]
    assert jnp.allclose(out, ref, atol=1e-6, rtol=1e-6), "mismatch (pe_resident)"

    # 3) Small-batch / long-sequence: sublane-dense refold (B=2 folded into 16 x 8192 rows).
    B, S, D = 2, 2048, 32
    emb = jax.random.normal(k2, (B, S, D), dtype=jnp.float32)
    out = jax.block_until_ready(fwd(emb, pe_table))
    ref = emb + pe_table[None, :S, :]
    assert jnp.allclose(out, ref, atol=1e-6, rtol=1e-6), "mismatch (small-batch refold)"

    # 4) bf16 activations: add runs in f32 and the result is f32 (torch promotion);
    #    row tiles use the packed 16-row bf16 sublane tile.
    pe_table64 = make_positional_encoding_table(embedding_dim_size=64, max_sentences=2048)
    B, S, D = 16, 256, 64
    emb = jax.random.normal(k3, (B, S, D), dtype=jnp.bfloat16)
    out = jax.block_until_ready(fwd(emb, pe_table64))
    ref = emb + pe_table64[None, :S, :]
    assert out.dtype == jnp.float32
    assert jnp.allclose(out, ref, atol=1e-6, rtol=1e-6), "mismatch (bf16 promotion)"

    # 5) "pe phased" path (pe period > row tile -> 2-D (phase, batch) grid), forced small.
    B, S, D = 2, 256, 32
    emb = jax.random.normal(k0, (B, S, D), dtype=jnp.float32)
    out = positional_encoding_forward(
        emb, pe_table, lane_tile_target=256, block_bytes_target=8 * 1024, force_pallas=True)
    out = jax.block_until_ready(out)
    ref = emb + pe_table[None, :S, :]
    assert jnp.allclose(out, ref, atol=1e-6, rtol=1e-6), "mismatch (pe_phased)"

    print("KERNEL_OK")
</pallas_src>

<mosaic_0001>
module attributes {stable_mosaic.version = 11 : i64} {
  func.func @_pos_enc_add_kernel(%arg0: i32, %arg1: memref<2x256xf32, #tpu.memory_space<vmem>>, %arg2: memref<1x256xf32, #tpu.memory_space<vmem>>, %arg3: memref<2x256xf32, #tpu.memory_space<vmem>>) attributes {dimension_semantics = [#tpu.dimension_semantics<parallel>], iteration_bounds = array<i64: 1>, scalar_prefetch = 0 : i64, scratch_operands = 0 : i64, tpu.core_type = #tpu.core_type<tc>, window_params = [{transform_indices = @transform_0, window_bounds = array<i64: 2, 256>}, {transform_indices = @transform_1, window_bounds = array<i64: 1, 256>}, {transform_indices = @transform_2, window_bounds = array<i64: 2, 256>}]} {
    %c0 = arith.constant 0 : index
    %c0_0 = arith.constant 0 : index
    %0 = vector.load %arg1[%c0, %c0_0] : memref<2x256xf32, #tpu.memory_space<vmem>>, vector<2x256xf32>
    %c0_1 = arith.constant 0 : index
    %c0_2 = arith.constant 0 : index
    %1 = vector.load %arg2[%c0_1, %c0_2] : memref<1x256xf32, #tpu.memory_space<vmem>>, vector<1x256xf32>
    %2 = vector.broadcast %1 : vector<1x256xf32> to vector<2x256xf32>
    %3 = arith.addf %0, %2 : vector<2x256xf32>
    %c0_3 = arith.constant 0 : index
    %c0_4 = arith.constant 0 : index
    %4 = vector.load %arg3[%c0_3, %c0_4] : memref<2x256xf32, #tpu.memory_space<vmem>>, vector<2x256xf32>
    tpu.vector_store %arg3[%c0_3, %c0_4], %3 {strides = array<i32>} : memref<2x256xf32, #tpu.memory_space<vmem>>, vector<2x256xf32>,
    return
  }
  func.func @transform_0(%arg0: i32) -> (i32, i32) {
    %c0_i32 = arith.constant 0 : i32
    %c0_i32_0 = arith.constant 0 : i32
    return %c0_i32, %arg0 : i32, i32
  }
  func.func @transform_1(%arg0: i32) -> (i32, i32) {
    %c0_i32 = arith.constant 0 : i32
    %c0_i32_0 = arith.constant 0 : i32
    return %c0_i32, %arg0 : i32, i32
  }
  func.func @transform_2(%arg0: i32) -> (i32, i32) {
    %c0_i32 = arith.constant 0 : i32
    %c0_i32_0 = arith.constant 0 : i32
    return %c0_i32, %arg0 : i32, i32
  }
}

</mosaic_0001>

<bundles_post_ra>
// kernel: positional_encoding_forward.1
= control target key start
LH: loop header
LB: loop body
LE: loop exit
PB: predicated region body
PF: predicated region fallthrough
CT: control target
= control target key end

     0   :  { %vm17_vm0 = vcmask 1041408   ;;  %s50_s1 = inlined_call_operand.vmem [shape: f32[1,256], index: 1, kind: input, shape index: {}]   ;;  %s51_s0 = inlined_call_operand.vmem [shape: f32[2,256], index: 0, kind: input, shape index: {}]   ;;  %s52_s2 = inlined_call_operand.vmem [shape: f32[2,256], index: 2, kind: output, shape index: {}]  }
   0x1   :  { %v12_v0 = vld [vmem:[%s50_s1] sm:$0x3] }
   0x2   :  { %v14_v1 = vperm.slane %v12_v0, 0  ;;  %v15_v2 = vperm.slane %v12_v0, 1  ;;  %v11_v3 = vld [vmem:[%s51_s0] sm:$0xf] }
   0x4   :  { %v16_v4 = vrot.slane %v15_v2, 6 }
   0x6   :  { %v18_v5 = vsel %vm17_vm0, %v14_v1, %v16_v4 }
   0x7   :  { %v20_v6 = vadd.f32 %v18_v5, %v11_v3 }
   0x9   :  { %21 = vst [vmem:[%s52_s2] sm:$0xf] %v20_v6 }

</bundles_post_ra>
